<compile_context>
chip_gen: v6e
topology: v6e:2x2x1
jax: 0.10.0
libtpu: 0.0.40
codegen_flags: <defaults>
</compile_context>

<pallas_src>
import functools

import jax
import jax.numpy as jnp
from jax.experimental import pallas as pl
from jax.experimental.pallas import tpu as pltpu

TINY_NUMBER = 1e-6


def _cdiv(a, b):
    return (a + b - 1) // b


def _round_up(a, b):
    return _cdiv(a, b) * b


# ---------------------------------------------------------------------------
# Kernels: each grid step writes its own (8, 128) partial sum(s).
# ---------------------------------------------------------------------------
def _plain_partial_kernel(pred_ref, gt_ref, num_ref):
    """Per-tile sum of squared error, folded to a vreg-shaped (8,128) partial."""
    p = pred_ref[...].astype(jnp.float32)          # (TILE_M, 128)
    g = gt_ref[...].astype(jnp.float32)
    d = p - g
    sq = d * d
    # Fold TILE_M rows to one (8, 128) tile: pure VPU adds across vregs.
    num_ref[...] = jnp.sum(sq.reshape(-1, 8, 128), axis=0)[None, :, :]


def _masked_partial_kernel(pred_ref, gt_ref, num_ref, den_ref, *, n_valid,
                           tile_rows):
    """Per-tile partial sums of (sq * mask) and mask, mask = sum_c exp(-|d|)."""
    i = pl.program_id(0)
    p = pred_ref[...].astype(jnp.float32)          # (C, TILE_M, 128)
    g = gt_ref[...].astype(jnp.float32)
    d = p - g
    sq = d * d
    e = jnp.exp(-jnp.abs(d))                       # (C, TILE_M, 128)

    # Per-ray mask: reduce over the (small, leading) channel axis -> VPU adds.
    m = jnp.sum(e, axis=0)                         # (TILE_M, 128)
    sq_ray = jnp.sum(sq, axis=0)                   # (TILE_M, 128)

    # Mask out padded rays (ray index = (i*TILE_M + row)*128 + col).
    row = jax.lax.broadcasted_iota(jnp.int32, m.shape, 0)
    col = jax.lax.broadcasted_iota(jnp.int32, m.shape, 1)
    ray_idx = (i * tile_rows + row) * 128 + col
    m = jnp.where(ray_idx < n_valid, m, 0.0)

    num_tile = sq_ray * m                          # padded rays: sq_ray=0, m=0

    num_ref[...] = jnp.sum(num_tile.reshape(-1, 8, 128), axis=0)[None, :, :]
    den_ref[...] = jnp.sum(m.reshape(-1, 8, 128), axis=0)[None, :, :]


# ---------------------------------------------------------------------------
# Wrapper
# ---------------------------------------------------------------------------
def _img2mse_pallas(pred_rgb, gt_rgb, pred_mask):
    c = pred_rgb.shape[-1]
    pred2d = pred_rgb.reshape(-1, c)               # original dtype, no f32 cast
    gt2d = gt_rgb.reshape(-1, c)
    n = pred2d.shape[0]

    compiler_params = pltpu.CompilerParams(
        dimension_semantics=("parallel",),
        vmem_limit_bytes=32 * 1024 * 1024,
    )

    if pred_mask:
        # Channels on the leading axis, rays lane-dense: [C, Nb, 128].
        nb_raw = _cdiv(n, 128)
        tile_m = min(512, _round_up(nb_raw, 8))    # 3*512*128*4B = 768 KiB/buf
        nb = _round_up(nb_raw, tile_m)
        n_pad = nb * 128
        pred_t = jnp.pad(pred2d.T, ((0, 0), (0, n_pad - n))).reshape(c, nb, 128)
        gt_t = jnp.pad(gt2d.T, ((0, 0), (0, n_pad - n))).reshape(c, nb, 128)
        grid = (nb // tile_m,)

        kernel = functools.partial(
            _masked_partial_kernel, n_valid=n, tile_rows=tile_m)

        num_p, den_p = pl.pallas_call(
            kernel,
            out_shape=(
                jax.ShapeDtypeStruct((grid[0], 8, 128), jnp.float32),
                jax.ShapeDtypeStruct((grid[0], 8, 128), jnp.float32),
            ),
            grid_spec=pltpu.PrefetchScalarGridSpec(
                num_scalar_prefetch=0,
                grid=grid,
                in_specs=[
                    pl.BlockSpec((c, tile_m, 128), lambda i: (0, i, 0)),
                    pl.BlockSpec((c, tile_m, 128), lambda i: (0, i, 0)),
                ],
                out_specs=(
                    pl.BlockSpec((1, 8, 128), lambda i: (i, 0, 0)),
                    pl.BlockSpec((1, 8, 128), lambda i: (i, 0, 0)),
                ),
            ),
            compiler_params=compiler_params,
        )(pred_t, gt_t)

        num = jnp.sum(num_p)
        den = jnp.sum(den_p)
        return num / (den * jnp.float32(c) + TINY_NUMBER)

    # Plain MSE: fully lane-dense flat layout [M, 128].
    total = n * c
    mb_raw = _cdiv(total, 128)
    tile_m = min(2048, _round_up(mb_raw, 8))       # 2048*128*4B = 1 MiB/buf
    mb = _round_up(mb_raw, tile_m)
    total_pad = mb * 128
    p_flat = jnp.pad(pred2d.reshape(-1), (0, total_pad - total)).reshape(mb, 128)
    g_flat = jnp.pad(gt2d.reshape(-1), (0, total_pad - total)).reshape(mb, 128)
    grid = (mb // tile_m,)

    num_p = pl.pallas_call(
        _plain_partial_kernel,
        out_shape=jax.ShapeDtypeStruct((grid[0], 8, 128), jnp.float32),
        grid_spec=pltpu.PrefetchScalarGridSpec(
            num_scalar_prefetch=0,
            grid=grid,
            in_specs=[
                pl.BlockSpec((tile_m, 128), lambda i: (i, 0)),
                pl.BlockSpec((tile_m, 128), lambda i: (i, 0)),
            ],
            out_specs=pl.BlockSpec((1, 8, 128), lambda i: (i, 0, 0)),
        ),
        compiler_params=compiler_params,
    )(p_flat, g_flat)

    # Zero-padded elements contribute 0 to the sum; divide by the true count.
    return jnp.sum(num_p) / jnp.float32(total)


def criterion_forward(outputs, ray_batch, scalars_to_log, pred_mask):
    """JAX/Pallas equivalent of Criterion.forward."""
    pred_rgb = outputs["rgb"]
    gt_rgb = ray_batch["rgb"]
    loss = _img2mse_pallas(pred_rgb, gt_rgb, pred_mask)
    return loss, scalars_to_log


# ---------------------------------------------------------------------------
# Pure-JAX reference
# ---------------------------------------------------------------------------
def _img2mse_ref(pred, gt, pred_mask):
    pred = pred.astype(jnp.float32)
    gt = gt.astype(jnp.float32)
    d = pred - gt
    if pred_mask:
        mask = jnp.sum(jnp.exp(-jnp.abs(d)), axis=-1)
        return jnp.sum(d * d * mask[..., None]) / (
            jnp.sum(mask) * pred.shape[-1] + TINY_NUMBER
        )
    return jnp.mean(d * d)


if __name__ == "__main__":
    key = jax.random.PRNGKey(0)
    k1, k2 = jax.random.split(key)

    # Small ray batch with a leading batch dim and a ray count that is NOT a
    # multiple of 128, to exercise the padding/masking path: 4 x 125 = 500 rays.
    shape = (4, 125, 3)
    pred_rgb = jax.random.uniform(k1, shape, dtype=jnp.float32)
    gt_rgb = jax.random.uniform(k2, shape, dtype=jnp.float32)

    outputs = {"rgb": pred_rgb}
    ray_batch = {"rgb": gt_rgb}
    scalars_to_log = {}

    ok = True
    for pred_mask in (True, False):
        loss, _ = criterion_forward(outputs, ray_batch, scalars_to_log, pred_mask)
        loss = jax.block_until_ready(loss)
        ref = jax.block_until_ready(_img2mse_ref(pred_rgb, gt_rgb, pred_mask))
        if not jnp.allclose(loss, ref, rtol=1e-5, atol=1e-6):
            ok = False
            print("MISMATCH pred_mask=%s: got %r ref %r" % (pred_mask, loss, ref))

    if ok:
        print("KERNEL_OK")
</pallas_src>

<mosaic_0001>
module attributes {stable_mosaic.version = 11 : i64} {
  func.func @_masked_partial_kernel(%arg0: i32, %arg1: memref<3x8x128xf32, #tpu.memory_space<vmem>>, %arg2: memref<3x8x128xf32, #tpu.memory_space<vmem>>, %arg3: memref<1x8x128xf32, #tpu.memory_space<vmem>>, %arg4: memref<1x8x128xf32, #tpu.memory_space<vmem>>) attributes {dimension_semantics = [#tpu.dimension_semantics<parallel>], iteration_bounds = array<i64: 1>, scalar_prefetch = 0 : i64, scratch_operands = 0 : i64, tpu.core_type = #tpu.core_type<tc>, window_params = [{transform_indices = @transform_0, window_bounds = array<i64: 3, 8, 128>}, {transform_indices = @transform_1, window_bounds = array<i64: 3, 8, 128>}, {transform_indices = @transform_2, window_bounds = array<i64: 1, 8, 128>}, {transform_indices = @transform_3, window_bounds = array<i64: 1, 8, 128>}]} {
    %c0 = arith.constant 0 : index
    %c0_0 = arith.constant 0 : index
    %c0_1 = arith.constant 0 : index
    %0 = vector.load %arg1[%c0, %c0_0, %c0_1] : memref<3x8x128xf32, #tpu.memory_space<vmem>>, vector<3x8x128xf32>
    %c0_2 = arith.constant 0 : index
    %c0_3 = arith.constant 0 : index
    %c0_4 = arith.constant 0 : index
    %1 = vector.load %arg2[%c0_2, %c0_3, %c0_4] : memref<3x8x128xf32, #tpu.memory_space<vmem>>, vector<3x8x128xf32>
    %2 = arith.subf %0, %1 : vector<3x8x128xf32>
    %3 = arith.mulf %2, %2 : vector<3x8x128xf32>
    %4 = math.absf %2 : vector<3x8x128xf32>
    %cst = arith.constant 0.000000e+00 : f32
    %5 = vector.broadcast %cst : f32 to vector<3x8x128xf32>
    %6 = arith.subf %5, %4 : vector<3x8x128xf32>
    %7 = math.exp %6 : vector<3x8x128xf32>
    %cst_5 = arith.constant dense<0.000000e+00> : vector<8x128xf32>
    %8 = vector.multi_reduction <add>, %7, %cst_5 [0] : vector<3x8x128xf32> to vector<8x128xf32>
    %cst_6 = arith.constant dense<0.000000e+00> : vector<8x128xf32>
    %9 = vector.multi_reduction <add>, %3, %cst_6 [0] : vector<3x8x128xf32> to vector<8x128xf32>
    %10 = tpu.iota {dimensions = array<i32: 0>} : vector<8x128xi32>
    %11 = tpu.iota {dimensions = array<i32: 1>} : vector<8x128xi32>
    %c8_i32 = arith.constant 8 : i32
    %12 = arith.muli %arg0, %c8_i32 : i32
    %13 = vector.broadcast %12 : i32 to vector<8x128xi32>
    %14 = arith.addi %13, %10 : vector<8x128xi32>
    %c128_i32 = arith.constant 128 : i32
    %15 = vector.broadcast %c128_i32 : i32 to vector<8x128xi32>
    %16 = arith.muli %14, %15 : vector<8x128xi32>
    %17 = arith.addi %16, %11 : vector<8x128xi32>
    %c500_i32 = arith.constant 500 : i32
    %18 = vector.broadcast %c500_i32 : i32 to vector<8x128xi32>
    %19 = arith.cmpi slt, %17, %18 : vector<8x128xi32>
    %cst_7 = arith.constant 0.000000e+00 : f32
    %20 = vector.broadcast %cst_7 : f32 to vector<8x128xf32>
    %21 = arith.select %19, %8, %20 : vector<8x128xi1>, vector<8x128xf32>
    %22 = arith.mulf %9, %21 : vector<8x128xf32>
    %23 = vector.shape_cast %22 : vector<8x128xf32> to vector<1x8x128xf32>
    %cst_8 = arith.constant dense<0.000000e+00> : vector<8x128xf32>
    %24 = vector.multi_reduction <add>, %23, %cst_8 [0] : vector<1x8x128xf32> to vector<8x128xf32>
    %25 = vector.shape_cast %24 : vector<8x128xf32> to vector<1x8x128xf32>
    %c0_9 = arith.constant 0 : index
    %c0_10 = arith.constant 0 : index
    %c0_11 = arith.constant 0 : index
    %26 = vector.load %arg3[%c0_9, %c0_10, %c0_11] : memref<1x8x128xf32, #tpu.memory_space<vmem>>, vector<1x8x128xf32>
    tpu.vector_store %arg3[%c0_9, %c0_10, %c0_11], %25 {strides = array<i32>} : memref<1x8x128xf32, #tpu.memory_space<vmem>>, vector<1x8x128xf32>,
    %27 = vector.shape_cast %21 : vector<8x128xf32> to vector<1x8x128xf32>
    %cst_12 = arith.constant dense<0.000000e+00> : vector<8x128xf32>
    %28 = vector.multi_reduction <add>, %27, %cst_12 [0] : vector<1x8x128xf32> to vector<8x128xf32>
    %29 = vector.shape_cast %28 : vector<8x128xf32> to vector<1x8x128xf32>
    %c0_13 = arith.constant 0 : index
    %c0_14 = arith.constant 0 : index
    %c0_15 = arith.constant 0 : index
    %30 = vector.load %arg4[%c0_13, %c0_14, %c0_15] : memref<1x8x128xf32, #tpu.memory_space<vmem>>, vector<1x8x128xf32>
    tpu.vector_store %arg4[%c0_13, %c0_14, %c0_15], %29 {strides = array<i32>} : memref<1x8x128xf32, #tpu.memory_space<vmem>>, vector<1x8x128xf32>,
    return
  }
  func.func @transform_0(%arg0: i32) -> (i32, i32, i32) {
    %c0_i32 = arith.constant 0 : i32
    %c0_i32_0 = arith.constant 0 : i32
    %c0_i32_1 = arith.constant 0 : i32
    return %c0_i32, %arg0, %c0_i32_0 : i32, i32, i32
  }
  func.func @transform_1(%arg0: i32) -> (i32, i32, i32) {
    %c0_i32 = arith.constant 0 : i32
    %c0_i32_0 = arith.constant 0 : i32
    %c0_i32_1 = arith.constant 0 : i32
    return %c0_i32, %arg0, %c0_i32_0 : i32, i32, i32
  }
  func.func @transform_2(%arg0: i32) -> (i32, i32, i32) {
    %c0_i32 = arith.constant 0 : i32
    %c0_i32_0 = arith.constant 0 : i32
    %c0_i32_1 = arith.constant 0 : i32
    return %arg0, %c0_i32, %c0_i32_0 : i32, i32, i32
  }
  func.func @transform_3(%arg0: i32) -> (i32, i32, i32) {
    %c0_i32 = arith.constant 0 : i32
    %c0_i32_0 = arith.constant 0 : i32
    %c0_i32_1 = arith.constant 0 : i32
    return %arg0, %c0_i32, %c0_i32_0 : i32, i32, i32
  }
}

</mosaic_0001>

<bundles_post_ra>
// kernel: tpu_custom_call.1
= control target key start
LH: loop header
LB: loop body
LE: loop exit
PB: predicated region body
PF: predicated region fallthrough
CT: control target
= control target key end

     0   :  { %9 = vsyncpa [#allocation3], 0  ;;  %s255_s0 = inlined_call_operand.hbm [shape: f32[3,8,128], index: 0, kind: input, shape index: {}]   ;;  %s256_s1 = inlined_call_operand.hbm [shape: f32[3,8,128], index: 1, kind: input, shape index: {}]   ;;  %s257_s2 = inlined_call_operand.hbm [shape: f32[1,8,128], index: 2, kind: output, shape index: {0}]   ;;  %s258_s3 = inlined_call_operand.hbm [shape: f32[1,8,128], index: 3, kind: output, shape index: {1}]  }
   0x1   :  { %10 = vsyncpa [#allocation6], 0 }
   0x2   :  { %11 = vsyncpa [#allocation4], 0 }
   0x3   :  { %12 = vsyncpa [#allocation9], 0  ;;  %s217_s12 = smov [#allocation2]  }
   0x4   :  { %s18_s13 = sshll.u32 %s217_s12, 4  ;;  %s19_s13 = int_to_ptr.vmem [resolvable:$true] %s18_s13 }
   0x5   :  { %s137_s14 = scalar_lea.vmem %s19_s13, 384  ;;  %p142_p1 = scmp.lt.s32.totalorder %s19_s13, %s19_s13 }
   0x6   :  { %p138_p0 = scmp.ne.s32.totalorder %s19_s13, %s137_s14  ;;  %p143_p2 = scmp.lt.s32.totalorder %s137_s14, %s137_s14 }
   0x8   :  { %p144_p3 = por %p143_p2, %p142_p1 }
   0xa   :  { %p145_p4 = pnand %p144_p3, %p138_p0 }
   0xc   :  { %148 = shalt.err (!%p145_p4)
}
   0xd   :  { %s218_s15 = smov 128   ;;  %s219_s16 = smov 8  }
   0xe   :  { %24 = dma.hbm_to_vmem [thread:$0]  %s255_s0, 384, %s19_s13, [#allocation3], %s218_s15, %s218_s15, %s219_s16  }
   0xf   :  { %s220_s19 = smov [#allocation5]  }
  0x10   :  { %s30_s20 = sshll.u32 %s220_s19, 4  ;;  %s31_s20 = int_to_ptr.vmem [resolvable:$true] %s30_s20 }
  0x11   :  { %s157_s21 = scalar_lea.vmem %s31_s20, 384  ;;  %p162_p6 = scmp.lt.s32.totalorder %s31_s20, %s31_s20 }
  0x12   :  { %p158_p5 = scmp.ne.s32.totalorder %s31_s20, %s157_s21  ;;  %p163_p7 = scmp.lt.s32.totalorder %s157_s21, %s157_s21 }
  0x14   :  { %p164_p8 = por %p163_p7, %p162_p6 }
  0x16   :  { %p165_p9 = pnand %p164_p8, %p158_p5 }
  0x18   :  { %168 = shalt.err (!%p165_p9)
}
  0x19   :  { %36 = dma.hbm_to_vmem [thread:$0]  %s256_s1, 384, %s31_s20, [#allocation6], %s218_s15, %s218_s15, %s219_s16  }
  0x1a   :  { %209 = dma.done.wait [#allocation3], 384  }
  0x1b   :  { %210 = vsyncadd [#allocation3], 4294966912 }
  0x1c   :  { %211 = dma.done.wait [#allocation6], 384  }
  0x1d   :  { %212 = vsyncadd [#allocation6], 4294966912  ;;  %v43_v0 = vld [vmem:[#allocation2] sm:$0xff]  ;;  %v44_v1 = vld [vmem:[#allocation2 + $0x8] sm:$0xff]  ;;  %v71_v18 = vlaneseq  ;;  %s221_s0 = smov [#allocation8]   ;;  %s222_s24 = smov [#allocation7]  }
  0x1e   :  { %v45_v2 = vld [vmem:[#allocation2 + $0x10] sm:$0xff]  ;;  %v46_v3 = vld [vmem:[#allocation5] sm:$0xff]  ;;  %v47_v4 = vld [vmem:[#allocation5 + $0x8] sm:$0xff]  ;;  %s103_s1 = sshll.u32 %s221_s0, 4  ;;  %s93_s25 = sshll.u32 %s222_s24, 4  ;;  %s104_s1 = int_to_ptr.vmem [resolvable:$true] %s103_s1  ;;  %s94_s25 = int_to_ptr.vmem [resolvable:$true] %s93_s25 }
  0x1f   :  { %v48_v5 = vld [vmem:[#allocation5 + $0x10] sm:$0xff]  ;;  %v49_v6 = vsub.f32 %v43_v0, %v46_v3  ;;  %v50_v7 = vsub.f32 %v44_v1, %v47_v4  ;;  %v72_v19 = vshrl.u32 %v71_v18, 7  ;;  %v74_v22 = vand.u32 127, %v71_v18  ;;  %s169_s26 = scalar_lea.vmem %s104_s1, 128  ;;  %p174_p11 = scmp.lt.s32.totalorder %s104_s1, %s104_s1 }
  0x20   :  { %v51_v8 = vsub.f32 %v45_v2, %v48_v5  ;;  %p170_p10 = scmp.ne.s32.totalorder %s104_s1, %s169_s26  ;;  %p175_p12 = scmp.lt.s32.totalorder %s169_s26, %s169_s26 }
  0x21   :  { %v55_v9 = vand.u32 2147483647, %v49_v6  ;;  %v56_v10 = vand.u32 2147483647, %v50_v7  ;;  %v52_v20 = vmul.f32 %v49_v6, %v49_v6  ;;  %v53_v21 = vmul.f32 %v50_v7, %v50_v7 }
  0x22   :  { %v57_v11 = vand.u32 2147483647, %v51_v8  ;;  %v78_v23 = vmul.u32 128, %v72_v19  ;;  %v54_v24 = vmul.f32 %v51_v8, %v51_v8  ;;  %p176_p13 = por %p175_p12, %p174_p11 }
  0x23   :  { %v58_v12 = vsub.f32 0.0, %v55_v9  ;;  %v59_v13 = vsub.f32 0.0, %v56_v10  ;;  %v69_v25 = vadd.f32 %v53_v21, %v52_v20 }
  0x24   :  { %v60_v14 = vsub.f32 0.0, %v57_v11  ;;  %v79_v26 = vadd.s32 %v78_v23, %v74_v22  ;;  %p177_p0 = pnand %p176_p13, %p170_p10 }
  0x25   :  { %v61_v15 = vmul.f32 1.442695, %v58_v12  ;;  %v63_v16 = vmul.f32 1.442695, %v59_v13  ;;  %v70_v31 = vadd.f32 %v69_v25, %v54_v24 }
  0x26   :  { %v65_v17 = vmul.f32 1.442695, %v60_v14  ;;  %vm80_vm0 = vcmp.lt.s32.totalorder %v79_v26, 500 }
  0x27   :  { %123 = vpow2.f32 %v61_v15 }
  0x28   :  { %125 = vpow2.f32 %v63_v16 }
  0x29   :  { %127 = vpow2.f32 %v65_v17 }
  0x34   :  { %v124_v27 = vpop.eup %123 }
  0x35   :  { %v126_v28 = vpop.eup %125 }
  0x36   :  { %v128_v29 = vpop.eup %127  ;;  %v67_v30 = vadd.f32 %v126_v28, %v124_v27 }
  0x38   :  { %v68_v32 = vadd.f32 %v128_v29, %v67_v30 }
  0x3a   :  { %v81_v33 = vsel %vm80_vm0, %v68_v32, 0.0 }
  0x3b   :  { %v82_v34 = vmul.f32 %v81_v33, %v70_v31  ;;  %86 = vst [vmem:[#allocation8] sm:$0xff] %v81_v33 }
  0x3c   :  { %180 = shalt.err (!%p177_p0)
}
  0x3d   :  { %106 = dma.vmem_to_hbm [thread:$0]  %s104_s1, 128, %s258_s3, [#allocation9]   ;;  %84 = vst [vmem:[#allocation7] sm:$0xff] %v82_v34 }
  0x3e   :  { %s189_s29 = scalar_lea.vmem %s94_s25, 128  ;;  %p194_p2 = scmp.lt.s32.totalorder %s94_s25, %s94_s25 }
  0x3f   :  { %p190_p1 = scmp.ne.s32.totalorder %s94_s25, %s189_s29  ;;  %p195_p3 = scmp.lt.s32.totalorder %s189_s29, %s189_s29 }
  0x41   :  { %p196_p4 = por %p195_p3, %p194_p2 }
  0x43   :  { %p197_p5 = pnand %p196_p4, %p190_p1 }
  0x45   :  { %200 = shalt.err (!%p197_p5)
}
  0x46   :  { %96 = dma.vmem_to_hbm [thread:$0]  %s94_s25, 128, %s257_s2, [#allocation4]  }
  0x47   :  { %213 = dma.done.wait [#allocation4], 128  }
  0x48   :  { %214 = vsyncadd [#allocation4], 4294967168 }
  0x49   :  { %215 = dma.done.wait [#allocation9], 128  }
  0x4a   :  { %216 = vsyncadd [#allocation9], 4294967168 }
  0x4b   :  { %113 = vsyncpa [#allocation3], 1 }
  0x4c   :  { %114 = vsyncpa [#allocation6], 1 }
  0x4d   :  { %115 = vsyncpa [#allocation4], 1 }
  0x4e   :  { %116 = vsyncpa [#allocation9], 1 }

</bundles_post_ra>
